<compile_context>
chip_gen: v7x
topology: tpu7x:2x2x1
jax: 0.10.0
libtpu: 0.0.40
codegen_flags: <defaults>
</compile_context>

<pallas_src>
import functools

import jax
import jax.numpy as jnp
from jax.experimental import pallas as pl
from jax.experimental.pallas import tpu as pltpu

TB = 1024           # batch tile (rows per grid step) for large batches


def _round_up(n, m):
    return ((n + m - 1) // m) * m


# --------------------------------------------------------------------------------------
# Kernel: 3-layer MLP (Linear -> ReLU -> Linear -> ReLU -> Linear), normalizer inverse
# affine already folded into the last layer.  All math in f32 (f32 accumulation on MXU).
# --------------------------------------------------------------------------------------
def _calibrator_kernel(x_ref, w1_ref, b1_ref, w2_ref, b2_ref, w3_ref, b3_ref, out_ref):
    x = x_ref[...]                                                   # (tb, F) f32
    h1 = jnp.dot(x, w1_ref[...], preferred_element_type=jnp.float32) + b1_ref[...]
    h1 = jnp.maximum(h1, 0.0)
    h2 = jnp.dot(h1, w2_ref[...], preferred_element_type=jnp.float32) + b2_ref[...]
    h2 = jnp.maximum(h2, 0.0)
    y = jnp.dot(h2, w3_ref[...], preferred_element_type=jnp.float32) + b3_ref[...]
    out_ref[...] = y.astype(out_ref.dtype)                           # (tb, O) f32


# --------------------------------------------------------------------------------------
# Fully-fused forward: pad batch -> pallas_call -> slice -> split into dict, one jit.
# --------------------------------------------------------------------------------------
@functools.partial(jax.jit, static_argnames=("col_spec",))
def _calibrator_forward_jit(x, w1, b1, w2, b2, w3, b3, *, col_spec):
    B, F = x.shape
    H = w1.shape[1]
    O = w3.shape[1]

    # Tile / bucket selection (static under jit).
    if B <= TB:
        tb = _round_up(max(B, 1), 8)      # small-batch path: one grid step, minimal padding
        Bp = tb
    else:
        tb = TB                           # large-batch path: bucket to TB multiples
        Bp = _round_up(B, TB)
    n_tiles = Bp // tb

    x_pad = x if Bp == B else jnp.pad(x, ((0, Bp - B), (0, 0)))

    resident = lambda shape: pl.BlockSpec(shape, lambda i: (0, 0))   # stays in VMEM across steps
    y_pad = pl.pallas_call(
        _calibrator_kernel,
        out_shape=jax.ShapeDtypeStruct((Bp, O), jnp.float32),
        grid=(n_tiles,),
        in_specs=[
            pl.BlockSpec((tb, F), lambda i: (i, 0)),                 # x: batch-tiled, unpadded F
            resident((F, H)), resident((1, H)),
            resident((H, H)), resident((1, H)),
            resident((H, O)), resident((1, O)),
        ],
        out_specs=pl.BlockSpec((tb, O), lambda i: (i, 0)),           # unpadded output width
        compiler_params=pltpu.CompilerParams(
            dimension_semantics=("parallel",)),                      # shards tiles over v7x's 2 TCs
    )(x_pad, w1, b1, w2, b2, w3, b3)

    y = y_pad[:B]                                                    # drop batch padding (fused)

    # normalizer.unstack: split stacked columns back into the predicted-values dict.
    out = {}
    off = 0
    for name, n in col_spec:
        out[name] = y[:, off:off + n]
        off += n
    return out


def calibrator_forward(x, prepared_params, predicted_values, columns_per_value):
    """Full Calibrator.forward: dtype/shape handling + fused Pallas MLP + unstack dict."""
    x = jnp.asarray(x, dtype=jnp.float32)
    if x.ndim == 1:
        x = x.reshape(1, -1)                                         # NN_inp.view(1, -1)

    params, inputs_size, outputs_size = prepared_params
    assert x.shape[1] == inputs_size

    col_spec = tuple((name, int(columns_per_value[name])) for name in predicted_values)
    assert sum(n for _, n in col_spec) == outputs_size
    return _calibrator_forward_jit(x, *params, col_spec=col_spec)


# --------------------------------------------------------------------------------------
# Parameter preparation (once, outside jit): fold the normalizer's inverse affine into
# the last layer.  Weights stay f32 (tiny, VMEM-resident) to preserve module precision.
# --------------------------------------------------------------------------------------
def prepare_params(raw_params, inputs_size, hidden_size, outputs_size):
    w1, b1, w2, b2, w3, b3, scale, shift = raw_params

    # Fold normalizer.unstack affine: y*scale + shift == x @ (w3*scale) + (b3*scale + shift).
    w3f = w3 * scale
    b3f = b3 * scale + shift

    params = tuple(jnp.asarray(p, jnp.float32) for p in (w1, b1, w2, b2, w3f, b3f))
    return (params, inputs_size, outputs_size)


def _make_raw_params(key, inputs_size, hidden_size, outputs_size):
    """Deterministic synthetic parameters (stand-in for load_state_dict).

    # TODO(synk): the original module loads weights from `weights_folder` via torch.load and
    # builds the normalizer from inputs_manager transforms; both are host-side glue and are
    # synthesized deterministically here instead.
    """
    ks = jax.random.split(key, 8)
    init = lambda k, shape, s: (jax.random.normal(k, shape, jnp.float32) * s)
    w1 = init(ks[0], (inputs_size, hidden_size), 0.1)
    b1 = init(ks[1], (1, hidden_size), 0.05)
    w2 = init(ks[2], (hidden_size, hidden_size), 0.1)
    b2 = init(ks[3], (1, hidden_size), 0.05)
    w3 = init(ks[4], (hidden_size, outputs_size), 0.1)
    b3 = init(ks[5], (1, outputs_size), 0.05)
    # InputsTransformer inverse transform: y_phys = y_norm * scale + shift
    scale = 1.0 + 0.5 * jax.random.uniform(ks[6], (1, outputs_size), jnp.float32)
    shift = init(ks[7], (1, outputs_size), 1.0)
    return (w1, b1, w2, b2, w3, b3, scale, shift)


# --------------------------------------------------------------------------------------
# Reference (pure f32 module semantics) for correctness checking.
# --------------------------------------------------------------------------------------
def _reference_forward_f32(x, raw_params):
    w1, b1, w2, b2, w3, b3, scale, shift = raw_params
    h1 = jnp.maximum(x @ w1 + b1, 0.0)
    h2 = jnp.maximum(h1 @ w2 + b2, 0.0)
    y = h2 @ w3 + b3
    return y * scale + shift


def _stack_dict(out_dict, predicted_values):
    return jnp.concatenate([out_dict[n] for n in predicted_values], axis=1)


if __name__ == "__main__":
    key = jax.random.PRNGKey(0)
    k_param, k_x_small, k_x_large = jax.random.split(key, 3)

    inputs_size = 32
    hidden_size = 64
    # predicted_values and how many stacked columns each occupies (outputs_size = sum).
    predicted_values = ["temperature", "pressure", "velocity", "density"]
    columns_per_value = {"temperature": 4, "pressure": 4, "velocity": 4, "density": 4}
    outputs_size = sum(columns_per_value.values())   # 16

    raw_params = _make_raw_params(k_param, inputs_size, hidden_size, outputs_size)
    prepared = prepare_params(raw_params, inputs_size, hidden_size, outputs_size)

    # --- small-batch path (single grid step, minimally padded tile) ---
    batch_small = 8
    x_small = jax.random.normal(k_x_small, (batch_small, inputs_size), jnp.float32)
    out_small = jax.block_until_ready(
        calibrator_forward(x_small, prepared, predicted_values, columns_per_value))
    y_small = _stack_dict(out_small, predicted_values)
    assert y_small.shape == (batch_small, outputs_size)
    ref_small = _reference_forward_f32(x_small, raw_params)
    assert jnp.allclose(y_small, ref_small, atol=3e-2, rtol=3e-2), "small-batch mismatch"

    # --- large-batch path (TB=1024 tiles, 2 grid steps -> exercises parallel grid) ---
    batch_large = 2048
    x_large = jax.random.normal(k_x_large, (batch_large, inputs_size), jnp.float32)
    out_large = jax.block_until_ready(
        calibrator_forward(x_large, prepared, predicted_values, columns_per_value))
    y_large = _stack_dict(out_large, predicted_values)
    assert y_large.shape == (batch_large, outputs_size)
    ref_large = _reference_forward_f32(x_large, raw_params)
    assert jnp.allclose(y_large, ref_large, atol=3e-2, rtol=3e-2), "large-batch mismatch"

    print("KERNEL_OK")
</pallas_src>

<mosaic_0001>
module attributes {stable_mosaic.version = 11 : i64} {
  func.func @_calibrator_kernel(%arg0: i32, %arg1: memref<8x32xf32, #tpu.memory_space<vmem>>, %arg2: memref<32x64xf32, #tpu.memory_space<vmem>>, %arg3: memref<1x64xf32, #tpu.memory_space<vmem>>, %arg4: memref<64x64xf32, #tpu.memory_space<vmem>>, %arg5: memref<1x64xf32, #tpu.memory_space<vmem>>, %arg6: memref<64x16xf32, #tpu.memory_space<vmem>>, %arg7: memref<1x16xf32, #tpu.memory_space<vmem>>, %arg8: memref<8x16xf32, #tpu.memory_space<vmem>>) attributes {dimension_semantics = [#tpu.dimension_semantics<parallel>], iteration_bounds = array<i64: 1>, scalar_prefetch = 0 : i64, scratch_operands = 0 : i64, tpu.core_type = #tpu.core_type<tc>, window_params = [{transform_indices = @transform_0, window_bounds = array<i64: 8, 32>}, {pipeline_mode = #tpu.pipeline_mode<synchronous>, transform_indices = @transform_1, window_bounds = array<i64: 32, 64>}, {pipeline_mode = #tpu.pipeline_mode<synchronous>, transform_indices = @transform_2, window_bounds = array<i64: 1, 64>}, {pipeline_mode = #tpu.pipeline_mode<synchronous>, transform_indices = @transform_3, window_bounds = array<i64: 64, 64>}, {pipeline_mode = #tpu.pipeline_mode<synchronous>, transform_indices = @transform_4, window_bounds = array<i64: 1, 64>}, {pipeline_mode = #tpu.pipeline_mode<synchronous>, transform_indices = @transform_5, window_bounds = array<i64: 64, 16>}, {pipeline_mode = #tpu.pipeline_mode<synchronous>, transform_indices = @transform_6, window_bounds = array<i64: 1, 16>}, {transform_indices = @transform_7, window_bounds = array<i64: 8, 16>}]} {
    %c0 = arith.constant 0 : index
    %c0_0 = arith.constant 0 : index
    %0 = vector.load %arg1[%c0, %c0_0] : memref<8x32xf32, #tpu.memory_space<vmem>>, vector<8x32xf32>
    %c0_1 = arith.constant 0 : index
    %c0_2 = arith.constant 0 : index
    %1 = vector.load %arg2[%c0_1, %c0_2] : memref<32x64xf32, #tpu.memory_space<vmem>>, vector<32x64xf32>
    %cst = arith.constant dense<0.000000e+00> : vector<8x64xf32>
    %2 = tpu.matmul %0, %1, %cst {dimension_numbers = #tpu.dot_dimension_numbers<[1], [0], [0], [1], [0, 0, 1, 1], [], []>} : vector<8x32xf32>, vector<32x64xf32>, vector<8x64xf32> -> vector<8x64xf32>
    %c0_3 = arith.constant 0 : index
    %c0_4 = arith.constant 0 : index
    %3 = vector.load %arg3[%c0_3, %c0_4] : memref<1x64xf32, #tpu.memory_space<vmem>>, vector<1x64xf32>
    %4 = vector.broadcast %3 : vector<1x64xf32> to vector<8x64xf32>
    %5 = arith.addf %2, %4 : vector<8x64xf32>
    %cst_5 = arith.constant 0.000000e+00 : f32
    %6 = vector.broadcast %cst_5 : f32 to vector<8x64xf32>
    %7 = arith.maximumf %5, %6 : vector<8x64xf32>
    %c0_6 = arith.constant 0 : index
    %c0_7 = arith.constant 0 : index
    %8 = vector.load %arg4[%c0_6, %c0_7] : memref<64x64xf32, #tpu.memory_space<vmem>>, vector<64x64xf32>
    %cst_8 = arith.constant dense<0.000000e+00> : vector<8x64xf32>
    %9 = tpu.matmul %7, %8, %cst_8 {dimension_numbers = #tpu.dot_dimension_numbers<[1], [0], [0], [1], [0, 0, 1, 1], [], []>} : vector<8x64xf32>, vector<64x64xf32>, vector<8x64xf32> -> vector<8x64xf32>
    %c0_9 = arith.constant 0 : index
    %c0_10 = arith.constant 0 : index
    %10 = vector.load %arg5[%c0_9, %c0_10] : memref<1x64xf32, #tpu.memory_space<vmem>>, vector<1x64xf32>
    %11 = vector.broadcast %10 : vector<1x64xf32> to vector<8x64xf32>
    %12 = arith.addf %9, %11 : vector<8x64xf32>
    %cst_11 = arith.constant 0.000000e+00 : f32
    %13 = vector.broadcast %cst_11 : f32 to vector<8x64xf32>
    %14 = arith.maximumf %12, %13 : vector<8x64xf32>
    %c0_12 = arith.constant 0 : index
    %c0_13 = arith.constant 0 : index
    %15 = vector.load %arg6[%c0_12, %c0_13] : memref<64x16xf32, #tpu.memory_space<vmem>>, vector<64x16xf32>
    %cst_14 = arith.constant dense<0.000000e+00> : vector<8x16xf32>
    %16 = tpu.matmul %14, %15, %cst_14 {dimension_numbers = #tpu.dot_dimension_numbers<[1], [0], [0], [1], [0, 0, 1, 1], [], []>} : vector<8x64xf32>, vector<64x16xf32>, vector<8x16xf32> -> vector<8x16xf32>
    %c0_15 = arith.constant 0 : index
    %c0_16 = arith.constant 0 : index
    %17 = vector.load %arg7[%c0_15, %c0_16] : memref<1x16xf32, #tpu.memory_space<vmem>>, vector<1x16xf32>
    %18 = vector.broadcast %17 : vector<1x16xf32> to vector<8x16xf32>
    %19 = arith.addf %16, %18 : vector<8x16xf32>
    %c0_17 = arith.constant 0 : index
    %c0_18 = arith.constant 0 : index
    %20 = vector.load %arg8[%c0_17, %c0_18] : memref<8x16xf32, #tpu.memory_space<vmem>>, vector<8x16xf32>
    tpu.vector_store %arg8[%c0_17, %c0_18], %19 {strides = array<i32>} : memref<8x16xf32, #tpu.memory_space<vmem>>, vector<8x16xf32>,
    return
  }
  func.func @transform_0(%arg0: i32) -> (i32, i32) {
    %c0_i32 = arith.constant 0 : i32
    %c0_i32_0 = arith.constant 0 : i32
    return %arg0, %c0_i32 : i32, i32
  }
  func.func @transform_1(%arg0: i32) -> (i32, i32) {
    %c0_i32 = arith.constant 0 : i32
    %c0_i32_0 = arith.constant 0 : i32
    %c0_i32_1 = arith.constant 0 : i32
    return %c0_i32, %c0_i32_0 : i32, i32
  }
  func.func @transform_2(%arg0: i32) -> (i32, i32) {
    %c0_i32 = arith.constant 0 : i32
    %c0_i32_0 = arith.constant 0 : i32
    %c0_i32_1 = arith.constant 0 : i32
    return %c0_i32, %c0_i32_0 : i32, i32
  }
  func.func @transform_3(%arg0: i32) -> (i32, i32) {
    %c0_i32 = arith.constant 0 : i32
    %c0_i32_0 = arith.constant 0 : i32
    %c0_i32_1 = arith.constant 0 : i32
    return %c0_i32, %c0_i32_0 : i32, i32
  }
  func.func @transform_4(%arg0: i32) -> (i32, i32) {
    %c0_i32 = arith.constant 0 : i32
    %c0_i32_0 = arith.constant 0 : i32
    %c0_i32_1 = arith.constant 0 : i32
    return %c0_i32, %c0_i32_0 : i32, i32
  }
  func.func @transform_5(%arg0: i32) -> (i32, i32) {
    %c0_i32 = arith.constant 0 : i32
    %c0_i32_0 = arith.constant 0 : i32
    %c0_i32_1 = arith.constant 0 : i32
    return %c0_i32, %c0_i32_0 : i32, i32
  }
  func.func @transform_6(%arg0: i32) -> (i32, i32) {
    %c0_i32 = arith.constant 0 : i32
    %c0_i32_0 = arith.constant 0 : i32
    %c0_i32_1 = arith.constant 0 : i32
    return %c0_i32, %c0_i32_0 : i32, i32
  }
  func.func @transform_7(%arg0: i32) -> (i32, i32) {
    %c0_i32 = arith.constant 0 : i32
    %c0_i32_0 = arith.constant 0 : i32
    return %arg0, %c0_i32 : i32, i32
  }
}

</mosaic_0001>

<bundles_post_ra>
// kernel: _calibrator_forward_jit.1
= control target key start
LH: loop header
LB: loop body
LE: loop exit
PB: predicated region body
PF: predicated region fallthrough
CT: control target
= control target key end

     0   :  { %12 = vsyncpa [#allocation3], 0  ;;  %s450_s24 = smov [#allocation2]   ;;  %s574_s0 = inlined_call_operand.vmem [shape: f32[8,32], index: 0, kind: input, shape index: {}]   ;;  %s575_s1 = inlined_call_operand.hbm [shape: f32[32,64], index: 1, kind: input, shape index: {}]   ;;  %s576_s2 = inlined_call_operand.vmem [shape: f32[1,64], index: 2, kind: input, shape index: {}]   ;;  %s577_s3 = inlined_call_operand.vmem [shape: f32[64,64], index: 3, kind: input, shape index: {}]   ;;  %s578_s4 = inlined_call_operand.vmem [shape: f32[1,64], index: 4, kind: input, shape index: {}]   ;;  %s579_s5 = inlined_call_operand.vmem [shape: f32[64,16], index: 5, kind: input, shape index: {}]   ;;  %s580_s6 = inlined_call_operand.vmem [shape: f32[1,16], index: 6, kind: input, shape index: {}]   ;;  %s581_s7 = inlined_call_operand.vmem [shape: f32[8,16], index: 7, kind: output, shape index: {}]  }
   0x1   :  { %s20_s25 = sshll.u32 %s450_s24, 4  ;;  %s426_s28 = scalar_lea.hbm %s575_s1, 512  ;;  %s21_s25 = int_to_ptr.vmem [resolvable:$true] %s20_s25 }
   0x2   :  { %p427_p0 = scmp.ne.s32.totalorder %s575_s1, %s426_s28  ;;  %p430_p1 = scmp.lt.u32.totalorder %s426_s28, %s575_s1 }
   0x4   :  { %p432_p2 = pnand %p430_p1, %p427_p0 }
   0x6   :  { %435 = shalt.err (!%p432_p2)
}
   0x7   :  { %s436_s10 = scalar_lea.vmem %s21_s25, 512  ;;  %p441_p4 = scmp.lt.s32.totalorder %s21_s25, %s21_s25 }
   0x8   :  { %p437_p3 = scmp.ne.s32.totalorder %s21_s25, %s436_s10  ;;  %p442_p5 = scmp.lt.s32.totalorder %s436_s10, %s436_s10 }
   0xa   :  { %p443_p6 = por %p442_p5, %p441_p4 }
   0xc   :  { %p444_p7 = pnand %p443_p6, %p437_p3 }
   0xe   :  { %447 = shalt.err (!%p444_p7)
}
   0xf   :  { %s451_s11 = smov 128   ;;  %s452_s12 = smov 8  }
  0x10   :  { %26 = dma.hbm_to_vmem [thread:$0]  %s575_s1, 512, %s21_s25, [#allocation3], %s451_s11, %s451_s11, %s452_s12  }
  0x11   :  { %448 = dma.done.wait [#allocation3], 512  }
  0x12   :  { %449 = vsyncadd [#allocation3], 4294966784  ;;  %v453_v0 = vmov 0.0|0.0   ;;  %vm454_vm0 = vmmov 0   ;;  %v455_v1 = vmov 0.0   ;;  %v41_v2 = vld [vmem:[#allocation2] sm:$0xff] }
  0x13   :  { %390 = vmatprep.subr.bf16.mxu0 %v453_v0  ;;  %349 = vmatprep.mubr.msk.f32.mxu0 %vm454_vm0, %v455_v1  ;;  %v42_v3 = vld [vmem:[#allocation2 + $0x8] sm:$0xff]  ;;  %v43_v4 = vld [vmem:[#allocation2 + $0x10] sm:$0xff]  ;;  %v44_v6 = vld [vmem:[#allocation2 + $0x18] sm:$0xff]  ;;  %vm52_vm1 = vcmask 261120   ;;  %vm142_vm2 = vcmask 523264   ;;  %vm305_vm3 = vcmask 130048  }
  0x14   :  { %396 = vmatprep.subr.bf16.mxu1 %v453_v0  ;;  %368 = vmatprep.mubr.msk.f32.mxu1 %vm454_vm0, %v455_v1  ;;  %v391_v5 = vpack.c.bf16 %v42_v3, %v41_v2  ;;  %v127_v7 = vld [vmem:[%s577_s3] sm:$0xff]  ;;  %v128_v8 = vld [vmem:[%s577_s3 + $0x8] sm:$0xff]  ;;  %v129_v9 = vld [vmem:[%s577_s3 + $0x10] sm:$0xff]  ;;  %v394_v11 = vpack.c.bf16 %v44_v6, %v43_v4 }
  0x15   :  { %v130_v10 = vld [vmem:[%s577_s3 + $0x18] sm:$0xff]  ;;  %v397_v12 = vpack.c.bf16 %v128_v8, %v127_v7  ;;  %v131_v14 = vld [vmem:[%s577_s3 + $0x20] sm:$0xff]  ;;  %v132_v15 = vld [vmem:[%s577_s3 + $0x28] sm:$0xff] }
  0x16   :  { %392 = vmatpush3.bf16.msra.mxu0 %v391_v5  ;;  %v400_v13 = vpack.c.bf16 %v130_v10, %v129_v9  ;;  %v40_v16 = vld [vmem:[%s574_s0] sm:$0xff]  ;;  %v403_v17 = vpack.c.bf16 %v132_v15, %v131_v14  ;;  %v133_v18 = vld [vmem:[%s577_s3 + $0x30] sm:$0xff]  ;;  %v134_v19 = vld [vmem:[%s577_s3 + $0x38] sm:$0xff] }
  0x17   :  { %393 = vmatprep.subr.bf16.mxu0 %v453_v0  ;;  %398 = vmatpush3.bf16.msra.mxu1 %v397_v12  ;;  %v406_v20 = vpack.c.bf16 %v134_v19, %v133_v18  ;;  %v217_v21 = vld [vmem:[%s579_s5] sm:$0xff]  ;;  %v218_v22 = vld [vmem:[%s579_s5 + $0x8] sm:$0xff]  ;;  %v219_v23 = vld [vmem:[%s579_s5 + $0x10] sm:$0xff] }
  0x18   :  { %399 = vmatprep.subr.bf16.mxu1 %v453_v0  ;;  %v409_v24 = vpack.c.bf16 %v218_v22, %v217_v21  ;;  %v220_v25 = vld [vmem:[%s579_s5 + $0x18] sm:$0xff]  ;;  %v221_v27 = vld [vmem:[%s579_s5 + $0x20] sm:$0xff]  ;;  %v222_v28 = vld [vmem:[%s579_s5 + $0x28] sm:$0xff] }
  0x19   :  { %v412_v26 = vpack.c.bf16 %v220_v25, %v219_v23  ;;  %v415_v29 = vpack.c.bf16 %v222_v28, %v221_v27  ;;  %v312_v30 = vld [vmem:[%s576_s2] ss:$0 sm:$0xff]  ;;  %v223_v35 = vld [vmem:[%s579_s5 + $0x30] sm:$0xff]  ;;  %v224_v36 = vld [vmem:[%s579_s5 + $0x38] sm:$0xff] }
  0x1a   :  { %395 = vmatpush3.bf16.msra.mxu0 %v394_v11  ;;  %v418_v37 = vpack.c.bf16 %v224_v36, %v223_v35  ;;  %v314_v38 = vld [vmem:[%s578_s4] ss:$0 sm:$0xff] }
  0x1b   :  { %408 = vmatprep.subr.bf16.mxu0 %v453_v0  ;;  %401 = vmatpush3.bf16.msra.mxu1 %v400_v13  ;;  %v316_v43 = vld [vmem:[%s580_s6] ss:$0 sm:$0xff] }
  0x1c   :  { %402 = vmatprep.subr.bf16.mxu1 %v453_v0 }
  0x1d   :  { %350 = vmatmul.mubr.msk.f32.vlgmr.msra.gmra.mrb[0].mxu0 %vm52_vm1, %v40_v16 }
  0x1e   :  { %387 = vmatprep.mubr.msk.f32.mxu0 %vm454_vm0, %v455_v1  ;;  %410 = vmatpush3.bf16.msra.mxu0 %v409_v24 }
  0x1f   :  { %404 = vmatpush3.bf16.msra.mxu1 %v403_v17  ;;  %411 = vmatprep.subr.bf16.mxu0 %v453_v0 }
  0x20   :  { %405 = vmatprep.subr.bf16.mxu1 %v453_v0 }
  0x22   :  { %413 = vmatpush3.bf16.msra.mxu0 %v412_v26 }
  0x23   :  { %407 = vmatpush3.bf16.msra.mxu1 %v406_v20  ;;  %414 = vmatprep.subr.bf16.mxu0 %v453_v0 }
  0x26   :  { %416 = vmatpush3.bf16.msra.mxu0 %v415_v29 }
  0x27   :  { %417 = vmatprep.subr.bf16.mxu0 %v453_v0 }
  0x2a   :  { %419 = vmatpush3.bf16.msra.mxu0 %v418_v37 }
  0xf0   :  { %v122_v31 = vpop.f32.mrb[0].mxu0 }
  0xf1   :  { %v123_v32 = vadd.f32 %v312_v30, %v122_v31  ;;  %v351_v33 = vpop.f32.mrb[1].mxu0 }
  0xf3   :  { %v126_v34 = vmax.f32 %v123_v32, 0.0 }
  0xf5   :  { %369 = vmatmul.mubr.msk.f32.vlgmr.msra.gmra.mrb[0].mxu1 %vm142_vm2, %v126_v34 }
 0x1c8   :  { %v212_v39 = vpop.f32.mrb[0].mxu1 }
 0x1c9   :  { %v213_v40 = vadd.f32 %v314_v38, %v212_v39  ;;  %v370_v41 = vpop.f32.mrb[1].mxu1 }
 0x1cb   :  { %v216_v42 = vmax.f32 %v213_v40, 0.0 }
 0x1cd   :  { %388 = vmatmul.mubr.msk.f32.vlgmr.msra.gmra.mrb[2].mxu0 %vm142_vm2, %v216_v42 }
 0x2a0   :  { %v301_v44 = vpop.f32.mrb[2].mxu0 }
 0x2a1   :  { %v302_v45 = vadd.f32 %v316_v43, %v301_v44  ;;  %v389_v46 = vpop.f32.mrb[3].mxu0 }
 0x2a3   :  { %306 = vst.msk [vmem:[%s581_s7] sm:$0xff] %vm305_vm3, %v302_v45 }
 0x2a4   :  { %311 = vsyncpa [#allocation3], 1 }

</bundles_post_ra>
